<compile_context>
chip_gen: v7x
topology: tpu7x:2x2x1
jax: 0.10.0
libtpu: 0.0.40
codegen_flags: <defaults>
</compile_context>

<pallas_src>
import math
from functools import partial

import jax
import jax.numpy as jnp
from jax.experimental import pallas as pl
from jax.experimental.pallas import tpu as pltpu

# Reference path uses full-precision f32 matmuls so it is comparable with the
# kernel (Mosaic f32 dots are full precision).
jax.config.update("jax_default_matmul_precision", "highest")


def _round_up(x, m):
    return ((x + m - 1) // m) * m


# ---------------------------------------------------------------------------
# Kernel 1: fused  embedding-gather * sqrt(d_model)  +  positional encoding
# ---------------------------------------------------------------------------
def _embed_pe_kernel(ids_ref, emb_ref, pe_ref, out_ref, *, tb, seq, scale):
    # ids_ref : (N_pad,)        int32  SMEM  (scalar-prefetched token ids)
    # emb_ref : (vocab, d)      f32    VMEM  (resident table)
    # pe_ref  : (seq, d)        f32    VMEM  (resident positional encodings)
    # out_ref : (tb, d)         f32    VMEM
    base = pl.program_id(0) * tb
    for t in range(tb):                      # tb is static -> unrolled
        tok = ids_ref[base + t]              # scalar read from SMEM
        pos = (base + t) % seq               # position of this token in its sequence
        row = emb_ref[pl.ds(tok, 1), :] * scale + pe_ref[pl.ds(pos, 1), :]
        out_ref[pl.ds(t, 1), :] = row


def embed_with_pe(x_ids, emb_table, pe, *, block_tokens=128):
    """embedding(x) * sqrt(d_model) + pe[:seq]  ->  (batch, seq, d_model) f32."""
    vocab, d_model = emb_table.shape
    b, s = x_ids.shape
    n = b * s

    tb = min(block_tokens, _round_up(n, 8))
    n_pad = _round_up(n, tb)
    ids_flat = x_ids.reshape(-1).astype(jnp.int32)
    if n_pad > n:
        ids_flat = jnp.pad(ids_flat, (0, n_pad - n))   # pad tokens gather row 0, sliced off below
    pe_s = pe[:s]

    # TODO(synk): for production-sized vocab/d_model the table should live in
    # HBM (memory_space=pl.ANY) with double-buffered per-row DMA instead of a
    # VMEM-resident block (v7x has only 64 MiB VMEM per TensorCore).
    out = pl.pallas_call(
        partial(_embed_pe_kernel, tb=tb, seq=s, scale=float(math.sqrt(d_model))),
        out_shape=jax.ShapeDtypeStruct((n_pad, d_model), jnp.float32),
        grid_spec=pltpu.PrefetchScalarGridSpec(
            num_scalar_prefetch=1,
            grid=(n_pad // tb,),
            in_specs=[
                pl.BlockSpec((vocab, d_model), lambda i, ids: (0, 0)),  # resident table
                pl.BlockSpec((s, d_model), lambda i, ids: (0, 0)),      # resident PE
            ],
            out_specs=pl.BlockSpec((tb, d_model), lambda i, ids: (i, 0)),
        ),
        compiler_params=pltpu.CompilerParams(
            dimension_semantics=("parallel",),
            vmem_limit_bytes=32 * 1024 * 1024,
        ),
    )(ids_flat, emb_table, pe_s)

    return out[:n].reshape(b, s, d_model)


# ---------------------------------------------------------------------------
# Shared LayerNorm math (matches the PyTorch module: unbiased std, eps on std)
# ---------------------------------------------------------------------------
def _layer_norm(v, alpha, bias, eps):
    d = v.shape[-1]
    mean = jnp.mean(v, axis=-1, keepdims=True)
    var = jnp.sum((v - mean) ** 2, axis=-1, keepdims=True) / (d - 1)  # torch.std: unbiased
    return alpha * (v - mean) / (jnp.sqrt(var) + eps) + bias


# ---------------------------------------------------------------------------
# Kernel 2: one fused EncoderBlock (pre-norm MHA + residual, pre-norm FFN + residual)
# ---------------------------------------------------------------------------
def _encoder_layer_kernel(x_ref, mask_ref,
                          wq_ref, wk_ref, wv_ref, wo_ref,
                          w1_ref, b1_ref, w2_ref, b2_ref,
                          ln1a_ref, ln1b_ref, ln2a_ref, ln2b_ref,
                          out_ref, *, h, d_k, eps):
    x = x_ref[...]                 # (S, D)   (batch dim squeezed by BlockSpec)
    mask = mask_ref[...]           # (1, S)   key mask

    # ---- pre-norm multi-head self-attention + residual ----
    xn = _layer_norm(x, ln1a_ref[...], ln1b_ref[...], eps)
    q = jnp.dot(xn, wq_ref[...], preferred_element_type=jnp.float32)
    k = jnp.dot(xn, wk_ref[...], preferred_element_type=jnp.float32)
    v = jnp.dot(xn, wv_ref[...], preferred_element_type=jnp.float32)

    inv_sqrt_dk = 1.0 / math.sqrt(d_k)
    attn_out = jnp.zeros_like(x)
    for hh in range(h):            # h is static -> unrolled
        lo = hh * d_k
        qh = q[:, lo:lo + d_k]
        kh = k[:, lo:lo + d_k]
        vh = v[:, lo:lo + d_k]
        scores = jax.lax.dot_general(
            qh, kh, (((1,), (1,)), ((), ())),
            preferred_element_type=jnp.float32) * inv_sqrt_dk          # (S, S)
        scores = jnp.where(mask == 0, -1e9, scores)                    # broadcast over query rows
        m = jnp.max(scores, axis=-1, keepdims=True)
        p = jnp.exp(scores - m)
        attn = p / jnp.sum(p, axis=-1, keepdims=True)
        ctx_h = jnp.dot(attn, vh, preferred_element_type=jnp.float32)  # (S, d_k)
        # ctx @ w_o  ==  sum_h ctx_h @ w_o[h*d_k:(h+1)*d_k, :]
        attn_out = attn_out + jnp.dot(ctx_h, wo_ref[lo:lo + d_k, :],
                                      preferred_element_type=jnp.float32)
    x = x + attn_out

    # ---- pre-norm feed-forward + residual ----
    xn2 = _layer_norm(x, ln2a_ref[...], ln2b_ref[...], eps)
    hid = jnp.maximum(
        jnp.dot(xn2, w1_ref[...], preferred_element_type=jnp.float32) + b1_ref[...], 0.0)
    ffn = jnp.dot(hid, w2_ref[...], preferred_element_type=jnp.float32) + b2_ref[...]
    out_ref[...] = x + ffn


def encoder_layer(x, src_mask, p, *, h, eps=1e-5):
    b, s, d = x.shape
    d_ff = p["w1"].shape[1]

    def full_spec(shape):
        return pl.BlockSpec(shape, lambda bb, _shape=shape: (0,) * len(_shape))

    in_specs = [
        pl.BlockSpec((None, s, d), lambda bb: (bb, 0, 0)),   # x  (per-batch block)
        pl.BlockSpec((None, 1, s), lambda bb: (bb, 0, 0)),   # mask (per-batch block)
        full_spec((d, d)), full_spec((d, d)), full_spec((d, d)), full_spec((d, d)),
        full_spec((d, d_ff)), full_spec((1, d_ff)),
        full_spec((d_ff, d)), full_spec((1, d)),
        full_spec((1, d)), full_spec((1, d)), full_spec((1, d)), full_spec((1, d)),
    ]
    return pl.pallas_call(
        partial(_encoder_layer_kernel, h=h, d_k=d // h, eps=eps),
        out_shape=jax.ShapeDtypeStruct((b, s, d), jnp.float32),
        grid=(b,),
        in_specs=in_specs,
        out_specs=pl.BlockSpec((None, s, d), lambda bb: (bb, 0, 0)),
        compiler_params=pltpu.CompilerParams(dimension_semantics=("parallel",)),
    )(x, src_mask,
      p["wq"], p["wk"], p["wv"], p["wo"],
      p["w1"], p["b1"], p["w2"], p["b2"],
      p["ln1_a"], p["ln1_b"], p["ln2_a"], p["ln2_b"])


# ---------------------------------------------------------------------------
# Kernel 3: final LayerNorm
# ---------------------------------------------------------------------------
def _final_layernorm_kernel(x_ref, a_ref, b_ref, out_ref, *, eps):
    out_ref[...] = _layer_norm(x_ref[...], a_ref[...], b_ref[...], eps)


def final_layernorm(x, alpha, bias, *, eps=1e-5):
    b, s, d = x.shape
    return pl.pallas_call(
        partial(_final_layernorm_kernel, eps=eps),
        out_shape=jax.ShapeDtypeStruct((b, s, d), jnp.float32),
        grid=(b,),
        in_specs=[
            pl.BlockSpec((None, s, d), lambda bb: (bb, 0, 0)),
            pl.BlockSpec((1, d), lambda bb: (0, 0)),
            pl.BlockSpec((1, d), lambda bb: (0, 0)),
        ],
        out_specs=pl.BlockSpec((None, s, d), lambda bb: (bb, 0, 0)),
        compiler_params=pltpu.CompilerParams(dimension_semantics=("parallel",)),
    )(x, alpha, bias)


# ---------------------------------------------------------------------------
# Full Encoder forward (Pallas path)
# ---------------------------------------------------------------------------
def encoder_forward(params, x_ids, src_mask, *, h):
    x = embed_with_pe(x_ids, params["emb"], params["pe"])
    for lp in params["layers"]:
        x = encoder_layer(x, src_mask, lp, h=h)
    return final_layernorm(x, params["ln_a"], params["ln_b"])


# ---------------------------------------------------------------------------
# Pure-JAX reference (same math as the PyTorch module)
# ---------------------------------------------------------------------------
def encoder_reference(params, x_ids, src_mask, *, h):
    emb, pe = params["emb"], params["pe"]
    b, s = x_ids.shape
    d = emb.shape[1]
    d_k = d // h
    x = jnp.take(emb, x_ids, axis=0) * jnp.float32(math.sqrt(d)) + pe[None, :s]

    def ln(v, a, bb, eps=1e-5):
        mean = v.mean(-1, keepdims=True)
        var = jnp.sum((v - mean) ** 2, -1, keepdims=True) / (v.shape[-1] - 1)
        return a * (v - mean) / (jnp.sqrt(var) + eps) + bb

    for lp in params["layers"]:
        xn = ln(x, lp["ln1_a"], lp["ln1_b"])
        q = xn @ lp["wq"]
        k = xn @ lp["wk"]
        v = xn @ lp["wv"]
        qh = q.reshape(b, s, h, d_k).transpose(0, 2, 1, 3)
        kh = k.reshape(b, s, h, d_k).transpose(0, 2, 1, 3)
        vh = v.reshape(b, s, h, d_k).transpose(0, 2, 1, 3)
        scores = jnp.einsum("bhqd,bhkd->bhqk", qh, kh) / math.sqrt(d_k)
        scores = jnp.where(src_mask[:, None, :, :] == 0, -1e9, scores)
        attn = jax.nn.softmax(scores, axis=-1)
        ctx = jnp.einsum("bhqk,bhkd->bhqd", attn, vh)
        ctx = ctx.transpose(0, 2, 1, 3).reshape(b, s, d)
        x = x + ctx @ lp["wo"]
        xn2 = ln(x, lp["ln2_a"], lp["ln2_b"])
        hid = jax.nn.relu(xn2 @ lp["w1"] + lp["b1"])
        x = x + hid @ lp["w2"] + lp["b2"]
    return ln(x, params["ln_a"], params["ln_b"])


# ---------------------------------------------------------------------------
# Parameter construction (synthetic, deterministic)
# ---------------------------------------------------------------------------
def make_positional_encoding(d_model, seq_len):
    # Mirrors the PyTorch module's PE construction exactly (including its
    # div_term formulation).
    position = jnp.arange(seq_len, dtype=jnp.float32)[:, None]
    div_term = jnp.exp(jnp.arange(0, d_model, 2, dtype=jnp.float32)) * (
        -(math.log(10000.0) / d_model))
    pe = jnp.zeros((seq_len, d_model), dtype=jnp.float32)
    pe = pe.at[:, 0::2].set(jnp.sin(position * div_term))
    pe = pe.at[:, 1::2].set(jnp.cos(position * div_term))
    return pe


def init_params(key, vocab_size, d_model, n_layers, h, d_ff, max_seq_len):
    keys = iter(jax.random.split(key, 4 + n_layers * 8))
    params = {
        "emb": jax.random.normal(next(keys), (vocab_size, d_model), jnp.float32),
        "pe": make_positional_encoding(d_model, max_seq_len),
        "ln_a": jnp.ones((1, d_model), jnp.float32),
        "ln_b": jnp.zeros((1, d_model), jnp.float32),
        "layers": [],
    }
    for _ in range(n_layers):
        layer = {
            "wq": jax.random.normal(next(keys), (d_model, d_model), jnp.float32) / math.sqrt(d_model),
            "wk": jax.random.normal(next(keys), (d_model, d_model), jnp.float32) / math.sqrt(d_model),
            "wv": jax.random.normal(next(keys), (d_model, d_model), jnp.float32) / math.sqrt(d_model),
            "wo": jax.random.normal(next(keys), (d_model, d_model), jnp.float32) / math.sqrt(d_model),
            "w1": jax.random.normal(next(keys), (d_model, d_ff), jnp.float32) / math.sqrt(d_model),
            "b1": jax.random.normal(next(keys), (1, d_ff), jnp.float32) * 0.1,
            "w2": jax.random.normal(next(keys), (d_ff, d_model), jnp.float32) / math.sqrt(d_ff),
            "b2": jax.random.normal(next(keys), (1, d_model), jnp.float32) * 0.1,
            "ln1_a": jnp.ones((1, d_model), jnp.float32),
            "ln1_b": jnp.zeros((1, d_model), jnp.float32),
            "ln2_a": jnp.ones((1, d_model), jnp.float32),
            "ln2_b": jnp.zeros((1, d_model), jnp.float32),
        }
        params["layers"].append(layer)
    return params


if __name__ == "__main__":
    vocab_size, d_model, n_layers, h, d_ff = 64, 32, 2, 4, 64
    batch, seq, max_seq_len = 2, 8, 512

    root = jax.random.PRNGKey(0)
    k_param, k_ids = jax.random.split(root)
    params = init_params(k_param, vocab_size, d_model, n_layers, h, d_ff, max_seq_len)

    x_ids = jax.random.randint(k_ids, (batch, seq), 0, vocab_size, dtype=jnp.int32)
    src_mask = jnp.ones((batch, 1, seq), dtype=jnp.int32)
    src_mask = src_mask.at[1, 0, seq - 2:].set(0)   # mask the last two keys of batch 1

    out = encoder_forward(params, x_ids, src_mask, h=h)
    out = jax.block_until_ready(out)

    ref = encoder_reference(params, x_ids, src_mask, h=h)
    assert out.shape == (batch, seq, d_model)
    max_err = float(jnp.max(jnp.abs(out - ref)))
    assert jnp.allclose(out, ref, atol=1e-3, rtol=1e-3), f"max abs err {max_err}"

    # TODO(synk): self.attention_scores (stored as a module attribute in PyTorch)
    # is not exposed; only the forward output is produced.
    print("KERNEL_OK")
</pallas_src>

<mosaic_0001>
module attributes {stable_mosaic.version = 11 : i64} {
  func.func @_embed_pe_kernel(%arg0: i32, %arg1: memref<16xi32, #tpu.memory_space<smem>>, %arg2: memref<64x32xf32, #tpu.memory_space<vmem>>, %arg3: memref<8x32xf32, #tpu.memory_space<vmem>>, %arg4: memref<16x32xf32, #tpu.memory_space<vmem>>) attributes {dimension_semantics = [#tpu.dimension_semantics<parallel>], iteration_bounds = array<i64: 1>, scalar_prefetch = 1 : i64, scratch_operands = 0 : i64, tpu.core_type = #tpu.core_type<tc>, window_params = [{pipeline_mode = #tpu.pipeline_mode<synchronous>, transform_indices = @transform_0, window_bounds = array<i64: 64, 32>}, {pipeline_mode = #tpu.pipeline_mode<synchronous>, transform_indices = @transform_1, window_bounds = array<i64: 8, 32>}, {transform_indices = @transform_2, window_bounds = array<i64: 16, 32>}]} {
    %c16_i32 = arith.constant 16 : i32
    %0 = arith.muli %arg0, %c16_i32 : i32
    %c0_i32 = arith.constant 0 : i32
    %1 = arith.addi %0, %c0_i32 : i32
    %2 = arith.index_cast %1 : i32 to index
    %3 = memref.load %arg1[%2] : memref<16xi32, #tpu.memory_space<smem>>
    %c0_i32_0 = arith.constant 0 : i32
    %4 = arith.addi %0, %c0_i32_0 : i32
    %c8_i32 = arith.constant 8 : i32
    %c0_i32_1 = arith.constant 0 : i32
    %5 = arith.cmpi eq, %c8_i32, %c0_i32_1 : i32
    %c1_i32 = arith.constant 1 : i32
    %6 = arith.select %5, %c1_i32, %c8_i32 : i32
    %7 = arith.remsi %4, %6 : i32
    %c0_i32_2 = arith.constant 0 : i32
    %8 = arith.cmpi ne, %7, %c0_i32_2 : i32
    %c0_i32_3 = arith.constant 0 : i32
    %9 = arith.cmpi slt, %7, %c0_i32_3 : i32
    %c0_i32_4 = arith.constant 0 : i32
    %10 = arith.cmpi slt, %6, %c0_i32_4 : i32
    %11 = arith.xori %9, %10 : i1
    %12 = arith.andi %11, %8 : i1
    %13 = arith.addi %7, %6 : i32
    %14 = arith.select %12, %13, %7 : i32
    %15 = arith.index_cast %3 : i32 to index
    %c0 = arith.constant 0 : index
    %16 = vector.load %arg2[%15, %c0] : memref<64x32xf32, #tpu.memory_space<vmem>>, vector<1x32xf32>
    %cst = arith.constant 5.65685415 : f32
    %17 = vector.broadcast %cst : f32 to vector<1x32xf32>
    %18 = arith.mulf %16, %17 : vector<1x32xf32>
    %19 = arith.index_cast %14 : i32 to index
    %c0_5 = arith.constant 0 : index
    %20 = vector.load %arg3[%19, %c0_5] : memref<8x32xf32, #tpu.memory_space<vmem>>, vector<1x32xf32>
    %21 = arith.addf %18, %20 : vector<1x32xf32>
    %c0_6 = arith.constant 0 : index
    %c0_7 = arith.constant 0 : index
    %22 = vector.load %arg4[%c0_6, %c0_7] : memref<16x32xf32, #tpu.memory_space<vmem>>, vector<1x32xf32>
    tpu.vector_store %arg4[%c0_6, %c0_7], %21 {strides = array<i32>} : memref<16x32xf32, #tpu.memory_space<vmem>>, vector<1x32xf32>,
    %c1_i32_8 = arith.constant 1 : i32
    %23 = arith.addi %0, %c1_i32_8 : i32
    %24 = arith.index_cast %23 : i32 to index
    %25 = memref.load %arg1[%24] : memref<16xi32, #tpu.memory_space<smem>>
    %c1_i32_9 = arith.constant 1 : i32
    %26 = arith.addi %0, %c1_i32_9 : i32
    %c8_i32_10 = arith.constant 8 : i32
    %c0_i32_11 = arith.constant 0 : i32
    %27 = arith.cmpi eq, %c8_i32_10, %c0_i32_11 : i32
    %c1_i32_12 = arith.constant 1 : i32
    %28 = arith.select %27, %c1_i32_12, %c8_i32_10 : i32
    %29 = arith.remsi %26, %28 : i32
    %c0_i32_13 = arith.constant 0 : i32
    %30 = arith.cmpi ne, %29, %c0_i32_13 : i32
    %c0_i32_14 = arith.constant 0 : i32
    %31 = arith.cmpi slt, %29, %c0_i32_14 : i32
    %c0_i32_15 = arith.constant 0 : i32
    %32 = arith.cmpi slt, %28, %c0_i32_15 : i32
    %33 = arith.xori %31, %32 : i1
    %34 = arith.andi %33, %30 : i1
    %35 = arith.addi %29, %28 : i32
    %36 = arith.select %34, %35, %29 : i32
    %37 = arith.index_cast %25 : i32 to index
    %c0_16 = arith.constant 0 : index
    %38 = vector.load %arg2[%37, %c0_16] : memref<64x32xf32, #tpu.memory_space<vmem>>, vector<1x32xf32>
    %cst_17 = arith.constant 5.65685415 : f32
    %39 = vector.broadcast %cst_17 : f32 to vector<1x32xf32>
    %40 = arith.mulf %38, %39 : vector<1x32xf32>
    %41 = arith.index_cast %36 : i32 to index
    %c0_18 = arith.constant 0 : index
    %42 = vector.load %arg3[%41, %c0_18] : memref<8x32xf32, #tpu.memory_space<vmem>>, vector<1x32xf32>
    %43 = arith.addf %40, %42 : vector<1x32xf32>
    %c1 = arith.constant 1 : index
    %c0_19 = arith.constant 0 : index
    %44 = vector.load %arg4[%c1, %c0_19] : memref<16x32xf32, #tpu.memory_space<vmem>>, vector<1x32xf32>
    tpu.vector_store %arg4[%c1, %c0_19], %43 {strides = array<i32>} : memref<16x32xf32, #tpu.memory_space<vmem>>, vector<1x32xf32>,
    %c2_i32 = arith.constant 2 : i32
    %45 = arith.addi %0, %c2_i32 : i32
    %46 = arith.index_cast %45 : i32 to index
    %47 = memref.load %arg1[%46] : memref<16xi32, #tpu.memory_space<smem>>
    %c2_i32_20 = arith.constant 2 : i32
    %48 = arith.addi %0, %c2_i32_20 : i32
    %c8_i32_21 = arith.constant 8 : i32
    %c0_i32_22 = arith.constant 0 : i32
    %49 = arith.cmpi eq, %c8_i32_21, %c0_i32_22 : i32
    %c1_i32_23 = arith.constant 1 : i32
    %50 = arith.select %49, %c1_i32_23, %c8_i32_21 : i32
    %51 = arith.remsi %48, %50 : i32
    %c0_i32_24 = arith.constant 0 : i32
    %52 = arith.cmpi ne, %51, %c0_i32_24 : i32
    %c0_i32_25 = arith.constant 0 : i32
    %53 = arith.cmpi slt, %51, %c0_i32_25 : i32
    %c0_i32_26 = arith.constant 0 : i32
    %54 = arith.cmpi slt, %50, %c0_i32_26 : i32
    %55 = arith.xori %53, %54 : i1
    %56 = arith.andi %55, %52 : i1
    %57 = arith.addi %51, %50 : i32
    %58 = arith.select %56, %57, %51 : i32
    %59 = arith.index_cast %47 : i32 to index
    %c0_27 = arith.constant 0 : index
    %60 = vector.load %arg2[%59, %c0_27] : memref<64x32xf32, #tpu.memory_space<vmem>>, vector<1x32xf32>
    %cst_28 = arith.constant 5.65685415 : f32
    %61 = vector.broadcast %cst_28 : f32 to vector<1x32xf32>
    %62 = arith.mulf %60, %61 : vector<1x32xf32>
    %63 = arith.index_cast %58 : i32 to index
    %c0_29 = arith.constant 0 : index
    %64 = vector.load %arg3[%63, %c0_29] : memref<8x32xf32, #tpu.memory_space<vmem>>, vector<1x32xf32>
    %65 = arith.addf %62, %64 : vector<1x32xf32>
    %c2 = arith.constant 2 : index
    %c0_30 = arith.constant 0 : index
    %66 = vector.load %arg4[%c2, %c0_30] : memref<16x32xf32, #tpu.memory_space<vmem>>, vector<1x32xf32>
    tpu.vector_store %arg4[%c2, %c0_30], %65 {strides = array<i32>} : memref<16x32xf32, #tpu.memory_space<vmem>>, vector<1x32xf32>,
    %c3_i32 = arith.constant 3 : i32
    %67 = arith.addi %0, %c3_i32 : i32
    %68 = arith.index_cast %67 : i32 to index
    %69 = memref.load %arg1[%68] : memref<16xi32, #tpu.memory_space<smem>>
    %c3_i32_31 = arith.constant 3 : i32
    %70 = arith.addi %0, %c3_i32_31 : i32
    %c8_i32_32 = arith.constant 8 : i32
    %c0_i32_33 = arith.constant 0 : i32
    %71 = arith.cmpi eq, %c8_i32_32, %c0_i32_33 : i32
    %c1_i32_34 = arith.constant 1 : i32
    %72 = arith.select %71, %c1_i32_34, %c8_i32_32 : i32
    %73 = arith.remsi %70, %72 : i32
    %c0_i32_35 = arith.constant 0 : i32
    %74 = arith.cmpi ne, %73, %c0_i32_35 : i32
    %c0_i32_36 = arith.constant 0 : i32
    %75 = arith.cmpi slt, %73, %c0_i32_36 : i32
    %c0_i32_37 = arith.constant 0 : i32
    %76 = arith.cmpi slt, %72, %c0_i32_37 : i32
    %77 = arith.xori %75, %76 : i1
    %78 = arith.andi %77, %74 : i1
    %79 = arith.addi %73, %72 : i32
    %80 = arith.select %78, %79, %73 : i32
    %81 = arith.index_cast %69 : i32 to index
    %c0_38 = arith.constant 0 : index
    %82 = vector.load %arg2[%81, %c0_38] : memref<64x32xf32, #tpu.memory_space<vmem>>, vector<1x32xf32>
    %cst_39 = arith.constant 5.65685415 : f32
    %83 = vector.broadcast %cst_39 : f32 to vector<1x32xf32>
    %84 = arith.mulf %82, %83 : vector<1x32xf32>
    %85 = arith.index_cast %80 : i32 to index
    %c0_40 = arith.constant 0 : index
    %86 = vector.load %arg3[%85, %c0_40] : memref<8x32xf32, #tpu.memory_space<vmem>>, vector<1x32xf32>
    %87 = arith.addf %84, %86 : vector<1x32xf32>
    %c3 = arith.constant 3 : index
    %c0_41 = arith.constant 0 : index
    %88 = vector.load %arg4[%c3, %c0_41] : memref<16x32xf32, #tpu.memory_space<vmem>>, vector<1x32xf32>
    tpu.vector_store %arg4[%c3, %c0_41], %87 {strides = array<i32>} : memref<16x32xf32, #tpu.memory_space<vmem>>, vector<1x32xf32>,
    %c4_i32 = arith.constant 4 : i32
    %89 = arith.addi %0, %c4_i32 : i32
    %90 = arith.index_cast %89 : i32 to index
    %91 = memref.load %arg1[%90] : memref<16xi32, #tpu.memory_space<smem>>
    %c4_i32_42 = arith.constant 4 : i32
    %92 = arith.addi %0, %c4_i32_42 : i32
    %c8_i32_43 = arith.constant 8 : i32
    %c0_i32_44 = arith.constant 0 : i32
    %93 = arith.cmpi eq, %c8_i32_43, %c0_i32_44 : i32
    %c1_i32_45 = arith.constant 1 : i32
    %94 = arith.select %93, %c1_i32_45, %c8_i32_43 : i32
    %95 = arith.remsi %92, %94 : i32
    %c0_i32_46 = arith.constant 0 : i32
    %96 = arith.cmpi ne, %95, %c0_i32_46 : i32
    %c0_i32_47 = arith.constant 0 : i32
    %97 = arith.cmpi slt, %95, %c0_i32_47 : i32
    %c0_i32_48 = arith.constant 0 : i32
    %98 = arith.cmpi slt, %94, %c0_i32_48 : i32
    %99 = arith.xori %97, %98 : i1
    %100 = arith.andi %99, %96 : i1
    %101 = arith.addi %95, %94 : i32
    %102 = arith.select %100, %101, %95 : i32
    %103 = arith.index_cast %91 : i32 to index
    %c0_49 = arith.constant 0 : index
    %104 = vector.load %arg2[%103, %c0_49] : memref<64x32xf32, #tpu.memory_space<vmem>>, vector<1x32xf32>
    %cst_50 = arith.constant 5.65685415 : f32
    %105 = vector.broadcast %cst_50 : f32 to vector<1x32xf32>
    %106 = arith.mulf %104, %105 : vector<1x32xf32>
    %107 = arith.index_cast %102 : i32 to index
    %c0_51 = arith.constant 0 : index
    %108 = vector.load %arg3[%107, %c0_51] : memref<8x32xf32, #tpu.memory_space<vmem>>, vector<1x32xf32>
    %109 = arith.addf %106, %108 : vector<1x32xf32>
    %c4 = arith.constant 4 : index
    %c0_52 = arith.constant 0 : index
    %110 = vector.load %arg4[%c4, %c0_52] : memref<16x32xf32, #tpu.memory_space<vmem>>, vector<1x32xf32>
    tpu.vector_store %arg4[%c4, %c0_52], %109 {strides = array<i32>} : memref<16x32xf32, #tpu.memory_space<vmem>>, vector<1x32xf32>,
    %c5_i32 = arith.constant 5 : i32
    %111 = arith.addi %0, %c5_i32 : i32
    %112 = arith.index_cast %111 : i32 to index
    %113 = memref.load %arg1[%112] : memref<16xi32, #tpu.memory_space<smem>>
    %c5_i32_53 = arith.constant 5 : i32
    %114 = arith.addi %0, %c5_i32_53 : i32
    %c8_i32_54 = arith.constant 8 : i32
    %c0_i32_55 = arith.constant 0 : i32
    %115 = arith.cmpi eq, %c8_i32_54, %c0_i32_55 : i32
    %c1_i32_56 = arith.constant 1 : i32
    %116 = arith.select %115, %c1_i32_56, %c8_i32_54 : i32
    %117 = arith.remsi %114, %116 : i32
    %c0_i32_57 = arith.constant 0 : i32
    %118 = arith.cmpi ne, %117, %c0_i32_57 : i32
    %c0_i32_58 = arith.constant 0 : i32
    %119 = arith.cmpi slt, %117, %c0_i32_58 : i32
    %c0_i32_59 = arith.constant 0 : i32
    %120 = arith.cmpi slt, %116, %c0_i32_59 : i32
    %121 = arith.xori %119, %120 : i1
    %122 = arith.andi %121, %118 : i1
    %123 = arith.addi %117, %116 : i32
    %124 = arith.select %122, %123, %117 : i32
    %125 = arith.index_cast %113 : i32 to index
    %c0_60 = arith.constant 0 : index
    %126 = vector.load %arg2[%125, %c0_60] : memref<64x32xf32, #tpu.memory_space<vmem>>, vector<1x32xf32>
    %cst_61 = arith.constant 5.65685415 : f32
    %127 = vector.broadcast %cst_61 : f32 to vector<1x32xf32>
    %128 = arith.mulf %126, %127 : vector<1x32xf32>
    %129 = arith.index_cast %124 : i32 to index
    %c0_62 = arith.constant 0 : index
    %130 = vector.load %arg3[%129, %c0_62] : memref<8x32xf32, #tpu.memory_space<vmem>>, vector<1x32xf32>
    %131 = arith.addf %128, %130 : vector<1x32xf32>
    %c5 = arith.constant 5 : index
    %c0_63 = arith.constant 0 : index
    %132 = vector.load %arg4[%c5, %c0_63] : memref<16x32xf32, #tpu.memory_space<vmem>>, vector<1x32xf32>
    tpu.vector_store %arg4[%c5, %c0_63], %131 {strides = array<i32>} : memref<16x32xf32, #tpu.memory_space<vmem>>, vector<1x32xf32>,
    %c6_i32 = arith.constant 6 : i32
    %133 = arith.addi %0, %c6_i32 : i32
    %134 = arith.index_cast %133 : i32 to index
    %135 = memref.load %arg1[%134] : memref<16xi32, #tpu.memory_space<smem>>
    %c6_i32_64 = arith.constant 6 : i32
    %136 = arith.addi %0, %c6_i32_64 : i32
    %c8_i32_65 = arith.constant 8 : i32
    %c0_i32_66 = arith.constant 0 : i32
    %137 = arith.cmpi eq, %c8_i32_65, %c0_i32_66 : i32
    %c1_i32_67 = arith.constant 1 : i32
    %138 = arith.select %137, %c1_i32_67, %c8_i32_65 : i32
    %139 = arith.remsi %136, %138 : i32
    %c0_i32_68 = arith.constant 0 : i32
    %140 = arith.cmpi ne, %139, %c0_i32_68 : i32
    %c0_i32_69 = arith.constant 0 : i32
    %141 = arith.cmpi slt, %139, %c0_i32_69 : i32
    %c0_i32_70 = arith.constant 0 : i32
    %142 = arith.cmpi slt, %138, %c0_i32_70 : i32
    %143 = arith.xori %141, %142 : i1
    %144 = arith.andi %143, %140 : i1
    %145 = arith.addi %139, %138 : i32
    %146 = arith.select %144, %145, %139 : i32
    %147 = arith.index_cast %135 : i32 to index
    %c0_71 = arith.constant 0 : index
    %148 = vector.load %arg2[%147, %c0_71] : memref<64x32xf32, #tpu.memory_space<vmem>>, vector<1x32xf32>
    %cst_72 = arith.constant 5.65685415 : f32
    %149 = vector.broadcast %cst_72 : f32 to vector<1x32xf32>
    %150 = arith.mulf %148, %149 : vector<1x32xf32>
    %151 = arith.index_cast %146 : i32 to index
    %c0_73 = arith.constant 0 : index
    %152 = vector.load %arg3[%151, %c0_73] : memref<8x32xf32, #tpu.memory_space<vmem>>, vector<1x32xf32>
    %153 = arith.addf %150, %152 : vector<1x32xf32>
    %c6 = arith.constant 6 : index
    %c0_74 = arith.constant 0 : index
    %154 = vector.load %arg4[%c6, %c0_74] : memref<16x32xf32, #tpu.memory_space<vmem>>, vector<1x32xf32>
    tpu.vector_store %arg4[%c6, %c0_74], %153 {strides = array<i32>} : memref<16x32xf32, #tpu.memory_space<vmem>>, vector<1x32xf32>,
    %c7_i32 = arith.constant 7 : i32
    %155 = arith.addi %0, %c7_i32 : i32
    %156 = arith.index_cast %155 : i32 to index
    %157 = memref.load %arg1[%156] : memref<16xi32, #tpu.memory_space<smem>>
    %c7_i32_75 = arith.constant 7 : i32
    %158 = arith.addi %0, %c7_i32_75 : i32
    %c8_i32_76 = arith.constant 8 : i32
    %c0_i32_77 = arith.constant 0 : i32
    %159 = arith.cmpi eq, %c8_i32_76, %c0_i32_77 : i32
    %c1_i32_78 = arith.constant 1 : i32
    %160 = arith.select %159, %c1_i32_78, %c8_i32_76 : i32
    %161 = arith.remsi %158, %160 : i32
    %c0_i32_79 = arith.constant 0 : i32
    %162 = arith.cmpi ne, %161, %c0_i32_79 : i32
    %c0_i32_80 = arith.constant 0 : i32
    %163 = arith.cmpi slt, %161, %c0_i32_80 : i32
    %c0_i32_81 = arith.constant 0 : i32
    %164 = arith.cmpi slt, %160, %c0_i32_81 : i32
    %165 = arith.xori %163, %164 : i1
    %166 = arith.andi %165, %162 : i1
    %167 = arith.addi %161, %160 : i32
    %168 = arith.select %166, %167, %161 : i32
    %169 = arith.index_cast %157 : i32 to index
    %c0_82 = arith.constant 0 : index
    %170 = vector.load %arg2[%169, %c0_82] : memref<64x32xf32, #tpu.memory_space<vmem>>, vector<1x32xf32>
    %cst_83 = arith.constant 5.65685415 : f32
    %171 = vector.broadcast %cst_83 : f32 to vector<1x32xf32>
    %172 = arith.mulf %170, %171 : vector<1x32xf32>
    %173 = arith.index_cast %168 : i32 to index
    %c0_84 = arith.constant 0 : index
    %174 = vector.load %arg3[%173, %c0_84] : memref<8x32xf32, #tpu.memory_space<vmem>>, vector<1x32xf32>
    %175 = arith.addf %172, %174 : vector<1x32xf32>
    %c7 = arith.constant 7 : index
    %c0_85 = arith.constant 0 : index
    %176 = vector.load %arg4[%c7, %c0_85] : memref<16x32xf32, #tpu.memory_space<vmem>>, vector<1x32xf32>
    tpu.vector_store %arg4[%c7, %c0_85], %175 {strides = array<i32>} : memref<16x32xf32, #tpu.memory_space<vmem>>, vector<1x32xf32>,
    %c8_i32_86 = arith.constant 8 : i32
    %177 = arith.addi %0, %c8_i32_86 : i32
    %178 = arith.index_cast %177 : i32 to index
    %179 = memref.load %arg1[%178] : memref<16xi32, #tpu.memory_space<smem>>
    %c8_i32_87 = arith.constant 8 : i32
    %180 = arith.addi %0, %c8_i32_87 : i32
    %c8_i32_88 = arith.constant 8 : i32
    %c0_i32_89 = arith.constant 0 : i32
    %181 = arith.cmpi eq, %c8_i32_88, %c0_i32_89 : i32
    %c1_i32_90 = arith.constant 1 : i32
    %182 = arith.select %181, %c1_i32_90, %c8_i32_88 : i32
    %183 = arith.remsi %180, %182 : i32
    %c0_i32_91 = arith.constant 0 : i32
    %184 = arith.cmpi ne, %183, %c0_i32_91 : i32
    %c0_i32_92 = arith.constant 0 : i32
    %185 = arith.cmpi slt, %183, %c0_i32_92 : i32
    %c0_i32_93 = arith.constant 0 : i32
    %186 = arith.cmpi slt, %182, %c0_i32_93 : i32
    %187 = arith.xori %185, %186 : i1
    %188 = arith.andi %187, %184 : i1
    %189 = arith.addi %183, %182 : i32
    %190 = arith.select %188, %189, %183 : i32
    %191 = arith.index_cast %179 : i32 to index
    %c0_94 = arith.constant 0 : index
    %192 = vector.load %arg2[%191, %c0_94] : memref<64x32xf32, #tpu.memory_space<vmem>>, vector<1x32xf32>
    %cst_95 = arith.constant 5.65685415 : f32
    %193 = vector.broadcast %cst_95 : f32 to vector<1x32xf32>
    %194 = arith.mulf %192, %193 : vector<1x32xf32>
    %195 = arith.index_cast %190 : i32 to index
    %c0_96 = arith.constant 0 : index
    %196 = vector.load %arg3[%195, %c0_96] : memref<8x32xf32, #tpu.memory_space<vmem>>, vector<1x32xf32>
    %197 = arith.addf %194, %196 : vector<1x32xf32>
    %c8 = arith.constant 8 : index
    %c0_97 = arith.constant 0 : index
    %198 = vector.load %arg4[%c8, %c0_97] : memref<16x32xf32, #tpu.memory_space<vmem>>, vector<1x32xf32>
    tpu.vector_store %arg4[%c8, %c0_97], %197 {strides = array<i32>} : memref<16x32xf32, #tpu.memory_space<vmem>>, vector<1x32xf32>,
    %c9_i32 = arith.constant 9 : i32
    %199 = arith.addi %0, %c9_i32 : i32
    %200 = arith.index_cast %199 : i32 to index
    %201 = memref.load %arg1[%200] : memref<16xi32, #tpu.memory_space<smem>>
    %c9_i32_98 = arith.constant 9 : i32
    %202 = arith.addi %0, %c9_i32_98 : i32
    %c8_i32_99 = arith.constant 8 : i32
    %c0_i32_100 = arith.constant 0 : i32
    %203 = arith.cmpi eq, %c8_i32_99, %c0_i32_100 : i32
    %c1_i32_101 = arith.constant 1 : i32
    %204 = arith.select %203, %c1_i32_101, %c8_i32_99 : i32
    %205 = arith.remsi %202, %204 : i32
    %c0_i32_102 = arith.constant 0 : i32
    %206 = arith.cmpi ne, %205, %c0_i32_102 : i32
    %c0_i32_103 = arith.constant 0 : i32
    %207 = arith.cmpi slt, %205, %c0_i32_103 : i32
    %c0_i32_104 = arith.constant 0 : i32
    %208 = arith.cmpi slt, %204, %c0_i32_104 : i32
    %209 = arith.xori %207, %208 : i1
    %210 = arith.andi %209, %206 : i1
    %211 = arith.addi %205, %204 : i32
    %212 = arith.select %210, %211, %205 : i32
    %213 = arith.index_cast %201 : i32 to index
    %c0_105 = arith.constant 0 : index
    %214 = vector.load %arg2[%213, %c0_105] : memref<64x32xf32, #tpu.memory_space<vmem>>, vector<1x32xf32>
    %cst_106 = arith.constant 5.65685415 : f32
    %215 = vector.broadcast %cst_106 : f32 to vector<1x32xf32>
    %216 = arith.mulf %214, %215 : vector<1x32xf32>
    %217 = arith.index_cast %212 : i32 to index
    %c0_107 = arith.constant 0 : index
    %218 = vector.load %arg3[%217, %c0_107] : memref<8x32xf32, #tpu.memory_space<vmem>>, vector<1x32xf32>
    %219 = arith.addf %216, %218 : vector<1x32xf32>
    %c9 = arith.constant 9 : index
    %c0_108 = arith.constant 0 : index
    %220 = vector.load %arg4[%c9, %c0_108] : memref<16x32xf32, #tpu.memory_space<vmem>>, vector<1x32xf32>
    tpu.vector_store %arg4[%c9, %c0_108], %219 {strides = array<i32>} : memref<16x32xf32, #tpu.memory_space<vmem>>, vector<1x32xf32>,
    %c10_i32 = arith.constant 10 : i32
    %221 = arith.addi %0, %c10_i32 : i32
    %222 = arith.index_cast %221 : i32 to index
    %223 = memref.load %arg1[%222] : memref<16xi32, #tpu.memory_space<smem>>
    %c10_i32_109 = arith.constant 10 : i32
    %224 = arith.addi %0, %c10_i32_109 : i32
    %c8_i32_110 = arith.constant 8 : i32
    %c0_i32_111 = arith.constant 0 : i32
    %225 = arith.cmpi eq, %c8_i32_110, %c0_i32_111 : i32
    %c1_i32_112 = arith.constant 1 : i32
    %226 = arith.select %225, %c1_i32_112, %c8_i32_110 : i32
    %227 = arith.remsi %224, %226 : i32
    %c0_i32_113 = arith.constant 0 : i32
    %228 = arith.cmpi ne, %227, %c0_i32_113 : i32
    %c0_i32_114 = arith.constant 0 : i32
    %229 = arith.cmpi slt, %227, %c0_i32_114 : i32
    %c0_i32_115 = arith.constant 0 : i32
    %230 = arith.cmpi slt, %226, %c0_i32_115 : i32
    %231 = arith.xori %229, %230 : i1
    %232 = arith.andi %231, %228 : i1
    %233 = arith.addi %227, %226 : i32
    %234 = arith.select %232, %233, %227 : i32
    %235 = arith.index_cast %223 : i32 to index
    %c0_116 = arith.constant 0 : index
    %236 = vector.load %arg2[%235, %c0_116] : memref<64x32xf32, #tpu.memory_space<vmem>>, vector<1x32xf32>
    %cst_117 = arith.constant 5.65685415 : f32
    %237 = vector.broadcast %cst_117 : f32 to vector<1x32xf32>
    %238 = arith.mulf %236, %237 : vector<1x32xf32>
    %239 = arith.index_cast %234 : i32 to index
    %c0_118 = arith.constant 0 : index
    %240 = vector.load %arg3[%239, %c0_118] : memref<8x32xf32, #tpu.memory_space<vmem>>, vector<1x32xf32>
    %241 = arith.addf %238, %240 : vector<1x32xf32>
    %c10 = arith.constant 10 : index
    %c0_119 = arith.constant 0 : index
    %242 = vector.load %arg4[%c10, %c0_119] : memref<16x32xf32, #tpu.memory_space<vmem>>, vector<1x32xf32>
    tpu.vector_store %arg4[%c10, %c0_119], %241 {strides = array<i32>} : memref<16x32xf32, #tpu.memory_space<vmem>>, vector<1x32xf32>,
    %c11_i32 = arith.constant 11 : i32
    %243 = arith.addi %0, %c11_i32 : i32
    %244 = arith.index_cast %243 : i32 to index
    %245 = memref.load %arg1[%244] : memref<16xi32, #tpu.memory_space<smem>>
    %c11_i32_120 = arith.constant 11 : i32
    %246 = arith.addi %0, %c11_i32_120 : i32
    %c8_i32_121 = arith.constant 8 : i32
    %c0_i32_122 = arith.constant 0 : i32
    %247 = arith.cmpi eq, %c8_i32_121, %c0_i32_122 : i32
    %c1_i32_123 = arith.constant 1 : i32
    %248 = arith.select %247, %c1_i32_123, %c8_i32_121 : i32
    %249 = arith.remsi %246, %248 : i32
    %c0_i32_124 = arith.constant 0 : i32
    %250 = arith.cmpi ne, %249, %c0_i32_124 : i32
    %c0_i32_125 = arith.constant 0 : i32
    %251 = arith.cmpi slt, %249, %c0_i32_125 : i32
    %c0_i32_126 = arith.constant 0 : i32
    %252 = arith.cmpi slt, %248, %c0_i32_126 : i32
    %253 = arith.xori %251, %252 : i1
    %254 = arith.andi %253, %250 : i1
    %255 = arith.addi %249, %248 : i32
    %256 = arith.select %254, %255, %249 : i32
    %257 = arith.index_cast %245 : i32 to index
    %c0_127 = arith.constant 0 : index
    %258 = vector.load %arg2[%257, %c0_127] : memref<64x32xf32, #tpu.memory_space<vmem>>, vector<1x32xf32>
    %cst_128 = arith.constant 5.65685415 : f32
    %259 = vector.broadcast %cst_128 : f32 to vector<1x32xf32>
    %260 = arith.mulf %258, %259 : vector<1x32xf32>
    %261 = arith.index_cast %256 : i32 to index
    %c0_129 = arith.constant 0 : index
    %262 = vector.load %arg3[%261, %c0_129] : memref<8x32xf32, #tpu.memory_space<vmem>>, vector<1x32xf32>
    %263 = arith.addf %260, %262 : vector<1x32xf32>
    %c11 = arith.constant 11 : index
    %c0_130 = arith.constant 0 : index
    %264 = vector.load %arg4[%c11, %c0_130] : memref<16x32xf32, #tpu.memory_space<vmem>>, vector<1x32xf32>
    tpu.vector_store %arg4[%c11, %c0_130], %263 {strides = array<i32>} : memref<16x32xf32, #tpu.memory_space<vmem>>, vector<1x32xf32>,
    %c12_i32 = arith.constant 12 : i32
    %265 = arith.addi %0, %c12_i32 : i32
    %266 = arith.index_cast %265 : i32 to index
    %267 = memref.load %arg1[%266] : memref<16xi32, #tpu.memory_space<smem>>
    %c12_i32_131 = arith.constant 12 : i32
    %268 = arith.addi %0, %c12_i32_131 : i32
    %c8_i32_132 = arith.constant 8 : i32
    %c0_i32_133 = arith.constant 0 : i32
    %269 = arith.cmpi eq, %c8_i32_132, %c0_i32_133 : i32
    %c1_i32_134 = arith.constant 1 : i32
    %270 = arith.select %269, %c1_i32_134, %c8_i32_132 : i32
    %271 = arith.remsi %268, %270 : i32
    %c0_i32_135 = arith.constant 0 : i32
    %272 = arith.cmpi ne, %271, %c0_i32_135 : i32
    %c0_i32_136 = arith.constant 0 : i32
    %273 = arith.cmpi slt, %271, %c0_i32_136 : i32
    %c0_i32_137 = arith.constant 0 : i32
    %274 = arith.cmpi slt, %270, %c0_i32_137 : i32
    %275 = arith.xori %273, %274 : i1
    %276 = arith.andi %275, %272 : i1
    %277 = arith.addi %271, %270 : i32
    %278 = arith.select %276, %277, %271 : i32
    %279 = arith.index_cast %267 : i32 to index
    %c0_138 = arith.constant 0 : index
    %280 = vector.load %arg2[%279, %c0_138] : memref<64x32xf32, #tpu.memory_space<vmem>>, vector<1x32xf32>
    %cst_139 = arith.constant 5.65685415 : f32
    %281 = vector.broadcast %cst_139 : f32 to vector<1x32xf32>
    %282 = arith.mulf %280, %281 : vector<1x32xf32>
    %283 = arith.index_cast %278 : i32 to index
    %c0_140 = arith.constant 0 : index
    %284 = vector.load %arg3[%283, %c0_140] : memref<8x32xf32, #tpu.memory_space<vmem>>, vector<1x32xf32>
    %285 = arith.addf %282, %284 : vector<1x32xf32>
    %c12 = arith.constant 12 : index
    %c0_141 = arith.constant 0 : index
    %286 = vector.load %arg4[%c12, %c0_141] : memref<16x32xf32, #tpu.memory_space<vmem>>, vector<1x32xf32>
    tpu.vector_store %arg4[%c12, %c0_141], %285 {strides = array<i32>} : memref<16x32xf32, #tpu.memory_space<vmem>>, vector<1x32xf32>,
    %c13_i32 = arith.constant 13 : i32
    %287 = arith.addi %0, %c13_i32 : i32
    %288 = arith.index_cast %287 : i32 to index
    %289 = memref.load %arg1[%288] : memref<16xi32, #tpu.memory_space<smem>>
    %c13_i32_142 = arith.constant 13 : i32
    %290 = arith.addi %0, %c13_i32_142 : i32
    %c8_i32_143 = arith.constant 8 : i32
    %c0_i32_144 = arith.constant 0 : i32
    %291 = arith.cmpi eq, %c8_i32_143, %c0_i32_144 : i32
    %c1_i32_145 = arith.constant 1 : i32
    %292 = arith.select %291, %c1_i32_145, %c8_i32_143 : i32
    %293 = arith.remsi %290, %292 : i32
    %c0_i32_146 = arith.constant 0 : i32
    %294 = arith.cmpi ne, %293, %c0_i32_146 : i32
    %c0_i32_147 = arith.constant 0 : i32
    %295 = arith.cmpi slt, %293, %c0_i32_147 : i32
    %c0_i32_148 = arith.constant 0 : i32
    %296 = arith.cmpi slt, %292, %c0_i32_148 : i32
    %297 = arith.xori %295, %296 : i1
    %298 = arith.andi %297, %294 : i1
    %299 = arith.addi %293, %292 : i32
    %300 = arith.select %298, %299, %293 : i32
    %301 = arith.index_cast %289 : i32 to index
    %c0_149 = arith.constant 0 : index
    %302 = vector.load %arg2[%301, %c0_149] : memref<64x32xf32, #tpu.memory_space<vmem>>, vector<1x32xf32>
    %cst_150 = arith.constant 5.65685415 : f32
    %303 = vector.broadcast %cst_150 : f32 to vector<1x32xf32>
    %304 = arith.mulf %302, %303 : vector<1x32xf32>
    %305 = arith.index_cast %300 : i32 to index
    %c0_151 = arith.constant 0 : index
    %306 = vector.load %arg3[%305, %c0_151] : memref<8x32xf32, #tpu.memory_space<vmem>>, vector<1x32xf32>
    %307 = arith.addf %304, %306 : vector<1x32xf32>
    %c13 = arith.constant 13 : index
    %c0_152 = arith.constant 0 : index
    %308 = vector.load %arg4[%c13, %c0_152] : memref<16x32xf32, #tpu.memory_space<vmem>>, vector<1x32xf32>
    tpu.vector_store %arg4[%c13, %c0_152], %307 {strides = array<i32>} : memref<16x32xf32, #tpu.memory_space<vmem>>, vector<1x32xf32>,
    %c14_i32 = arith.constant 14 : i32
    %309 = arith.addi %0, %c14_i32 : i32
    %310 = arith.index_cast %309 : i32 to index
    %311 = memref.load %arg1[%310] : memref<16xi32, #tpu.memory_space<smem>>
    %c14_i32_153 = arith.constant 14 : i32
    %312 = arith.addi %0, %c14_i32_153 : i32
    %c8_i32_154 = arith.constant 8 : i32
    %c0_i32_155 = arith.constant 0 : i32
    %313 = arith.cmpi eq, %c8_i32_154, %c0_i32_155 : i32
    %c1_i32_156 = arith.constant 1 : i32
    %314 = arith.select %313, %c1_i32_156, %c8_i32_154 : i32
    %315 = arith.remsi %312, %314 : i32
    %c0_i32_157 = arith.constant 0 : i32
    %316 = arith.cmpi ne, %315, %c0_i32_157 : i32
    %c0_i32_158 = arith.constant 0 : i32
    %317 = arith.cmpi slt, %315, %c0_i32_158 : i32
    %c0_i32_159 = arith.constant 0 : i32
    %318 = arith.cmpi slt, %314, %c0_i32_159 : i32
    %319 = arith.xori %317, %318 : i1
    %320 = arith.andi %319, %316 : i1
    %321 = arith.addi %315, %314 : i32
    %322 = arith.select %320, %321, %315 : i32
    %323 = arith.index_cast %311 : i32 to index
    %c0_160 = arith.constant 0 : index
    %324 = vector.load %arg2[%323, %c0_160] : memref<64x32xf32, #tpu.memory_space<vmem>>, vector<1x32xf32>
    %cst_161 = arith.constant 5.65685415 : f32
    %325 = vector.broadcast %cst_161 : f32 to vector<1x32xf32>
    %326 = arith.mulf %324, %325 : vector<1x32xf32>
    %327 = arith.index_cast %322 : i32 to index
    %c0_162 = arith.constant 0 : index
    %328 = vector.load %arg3[%327, %c0_162] : memref<8x32xf32, #tpu.memory_space<vmem>>, vector<1x32xf32>
    %329 = arith.addf %326, %328 : vector<1x32xf32>
    %c14 = arith.constant 14 : index
    %c0_163 = arith.constant 0 : index
    %330 = vector.load %arg4[%c14, %c0_163] : memref<16x32xf32, #tpu.memory_space<vmem>>, vector<1x32xf32>
    tpu.vector_store %arg4[%c14, %c0_163], %329 {strides = array<i32>} : memref<16x32xf32, #tpu.memory_space<vmem>>, vector<1x32xf32>,
    %c15_i32 = arith.constant 15 : i32
    %331 = arith.addi %0, %c15_i32 : i32
    %332 = arith.index_cast %331 : i32 to index
    %333 = memref.load %arg1[%332] : memref<16xi32, #tpu.memory_space<smem>>
    %c15_i32_164 = arith.constant 15 : i32
    %334 = arith.addi %0, %c15_i32_164 : i32
    %c8_i32_165 = arith.constant 8 : i32
    %c0_i32_166 = arith.constant 0 : i32
    %335 = arith.cmpi eq, %c8_i32_165, %c0_i32_166 : i32
    %c1_i32_167 = arith.constant 1 : i32
    %336 = arith.select %335, %c1_i32_167, %c8_i32_165 : i32
    %337 = arith.remsi %334, %336 : i32
    %c0_i32_168 = arith.constant 0 : i32
    %338 = arith.cmpi ne, %337, %c0_i32_168 : i32
    %c0_i32_169 = arith.constant 0 : i32
    %339 = arith.cmpi slt, %337, %c0_i32_169 : i32
    %c0_i32_170 = arith.constant 0 : i32
    %340 = arith.cmpi slt, %336, %c0_i32_170 : i32
    %341 = arith.xori %339, %340 : i1
    %342 = arith.andi %341, %338 : i1
    %343 = arith.addi %337, %336 : i32
    %344 = arith.select %342, %343, %337 : i32
    %345 = arith.index_cast %333 : i32 to index
    %c0_171 = arith.constant 0 : index
    %346 = vector.load %arg2[%345, %c0_171] : memref<64x32xf32, #tpu.memory_space<vmem>>, vector<1x32xf32>
    %cst_172 = arith.constant 5.65685415 : f32
    %347 = vector.broadcast %cst_172 : f32 to vector<1x32xf32>
    %348 = arith.mulf %346, %347 : vector<1x32xf32>
    %349 = arith.index_cast %344 : i32 to index
    %c0_173 = arith.constant 0 : index
    %350 = vector.load %arg3[%349, %c0_173] : memref<8x32xf32, #tpu.memory_space<vmem>>, vector<1x32xf32>
    %351 = arith.addf %348, %350 : vector<1x32xf32>
    %c15 = arith.constant 15 : index
    %c0_174 = arith.constant 0 : index
    %352 = vector.load %arg4[%c15, %c0_174] : memref<16x32xf32, #tpu.memory_space<vmem>>, vector<1x32xf32>
    tpu.vector_store %arg4[%c15, %c0_174], %351 {strides = array<i32>} : memref<16x32xf32, #tpu.memory_space<vmem>>, vector<1x32xf32>,
    return
  }
  func.func @transform_0(%arg0: i32, %arg1: memref<16xi32, #tpu.memory_space<smem>>) -> (i32, i32) {
    %c0_i32 = arith.constant 0 : i32
    %c0_i32_0 = arith.constant 0 : i32
    %c0_i32_1 = arith.constant 0 : i32
    return %c0_i32, %c0_i32_0 : i32, i32
  }
  func.func @transform_1(%arg0: i32, %arg1: memref<16xi32, #tpu.memory_space<smem>>) -> (i32, i32) {
    %c0_i32 = arith.constant 0 : i32
    %c0_i32_0 = arith.constant 0 : i32
    %c0_i32_1 = arith.constant 0 : i32
    return %c0_i32, %c0_i32_0 : i32, i32
  }
  func.func @transform_2(%arg0: i32, %arg1: memref<16xi32, #tpu.memory_space<smem>>) -> (i32, i32) {
    %c0_i32 = arith.constant 0 : i32
    %c0_i32_0 = arith.constant 0 : i32
    return %arg0, %c0_i32 : i32, i32
  }
}

</mosaic_0001>

<bundles_post_ra>
// kernel: tpu_custom_call.1
= control target key start
LH: loop header
LB: loop body
LE: loop exit
PB: predicated region body
PF: predicated region fallthrough
CT: control target
= control target key end

     0   :  { %s650_s0 = inlined_call_operand.vmem [shape: s32[16], index: 0, kind: input, shape index: {}]   ;;  %s651_s1 = inlined_call_operand.vmem [shape: f32[64,32], index: 1, kind: input, shape index: {}]   ;;  %s652_s2 = inlined_call_operand.vmem [shape: f32[8,32], index: 2, kind: input, shape index: {}]   ;;  %s653_s3 = inlined_call_operand.hbm [shape: f32[16,32], index: 3, kind: output, shape index: {}]  }
   0x1   :  { %s8_s14 = sshll.u32 %s650_s0, 4  ;;  %s9_s14 = int_to_ptr.vmem [resolvable:$true] %s8_s14 }
   0x2   :  { %s437_s15 = scalar_lea.vmem %s9_s14, 16  ;;  %p442_p1 = scmp.lt.s32.totalorder %s9_s14, %s9_s14 }
   0x3   :  { %p438_p0 = scmp.ne.s32.totalorder %s9_s14, %s437_s15  ;;  %p443_p2 = scmp.lt.s32.totalorder %s437_s15, %s437_s15 }
   0x5   :  { %p444_p3 = por %p443_p2, %p442_p1 }
   0x7   :  { %p445_p4 = pnand %p444_p3, %p438_p0 }
   0x9   :  { %448 = shalt.err (!%p445_p4)  }
   0xa   :  { %s475_s16 = smov [#allocation3]  }
   0xb   :  { %11 = dma.vmem_to_smem %s9_s14, 16, %s475_s16, [#allocation2] }
   0xc   :  { %471 = dma.done.wait [#allocation2], 16 }
   0xd   :  { %472 = vsyncadd [#allocation2], 4294967280 }
   0xe   :  { %13 = sfence }
   0xf   :  { %s20_s17 = sld [smem:[#allocation3]]  ;;  %s404_s18 = sld [smem:[#allocation3 + $0x1]]  ;;  %v37_v0 = vld [vmem:[%s652_s2] sm:$0x1]  ;;  %vm39_vm0 = vcmask 253952  }
  0x10   :  { %s406_s19 = sld [smem:[#allocation3 + $0x2]]  ;;  %s408_s20 = sld [smem:[#allocation3 + $0x3]]  ;;  %v405_v1 = vld [vmem:[%s652_s2 + $0x1] sm:$0x1]  ;;  %v407_v3 = vld [vmem:[%s652_s2 + $0x2] sm:$0x1] }
  0x11   :  { %s502_s21 = sld [smem:[#allocation3 + $0x4]]  ;;  %s504_s0 = sld [smem:[#allocation3 + $0x5]]  ;;  %v409_v4 = vld [vmem:[%s652_s2 + $0x3] sm:$0x1]  ;;  %v411_v8 = vld [vmem:[%s652_s2 + $0x4] sm:$0x1] }
  0x12   :  { %s506_s22 = sld [smem:[#allocation3 + $0x6]]  ;;  %s511_s25 = sld [smem:[#allocation3 + $0x7]]  ;;  %v413_v9 = vld [vmem:[%s652_s2 + $0x5] sm:$0x1]  ;;  %v415_v13 = vld [vmem:[%s652_s2 + $0x6] sm:$0x1] }
  0x13   :  { %s513_s26 = sld [smem:[#allocation3 + $0x8]]  ;;  %s521_s5 = sld [smem:[#allocation3 + $0x9]]  ;;  %v417_v18 = vld [vmem:[%s652_s2 + $0x7] sm:$0x1]  ;;  %v206_v19 = vld [vmem:[%s652_s2] sm:$0x1] }
  0x14   :  { %v420_v25 = vld [vmem:[%s652_s2 + $0x1] sm:$0x1]  ;;  %s589_s4 = sld [smem:[#allocation3 + $0xf]] }
  0x15   :  { %s33_s29 = scalar_lea.vmem %s651_s1, %s20_s17  ;;  %s55_s8 = scalar_lea.vmem %s651_s1, %s404_s18 }
  0x16   :  { %v34_v2 = vld [vmem:[%s33_s29] sm:$0x1]  ;;  %s76_s11 = scalar_lea.vmem %s651_s1, %s406_s19  ;;  %s97_s18 = scalar_lea.vmem %s651_s1, %s408_s20 }
  0x17   :  { %v35_v5 = vmul.f32 5.656854, %v34_v2  ;;  %v56_v6 = vld [vmem:[%s55_s8] sm:$0x1]  ;;  %s118_s30 = scalar_lea.vmem %s651_s1, %s502_s21  ;;  %s139_s20 = scalar_lea.vmem %s651_s1, %s504_s0 }
  0x18   :  { %v77_v7 = vld [vmem:[%s76_s11] sm:$0x1]  ;;  %v57_v10 = vmul.f32 5.656854, %v56_v6  ;;  %s160_s11 = scalar_lea.vmem %s651_s1, %s506_s22  ;;  %s181_s16 = scalar_lea.vmem %s651_s1, %s511_s25 }
  0x19   :  { %v78_v11 = vmul.f32 5.656854, %v77_v7  ;;  %v98_v12 = vld [vmem:[%s97_s18] sm:$0x1]  ;;  %v38_v14 = vadd.f32 %v37_v0, %v35_v5  ;;  %s202_s18 = scalar_lea.vmem %s651_s1, %s513_s26  ;;  %s223_s28 = scalar_lea.vmem %s651_s1, %s521_s5 }
  0x1a   :  { %v99_v15 = vmul.f32 5.656854, %v98_v12  ;;  %v119_v16 = vld [vmem:[%s118_s30] sm:$0x1]  ;;  %v60_v20 = vadd.f32 %v405_v1, %v57_v10  ;;  %s421_s25 = sld [smem:[#allocation3 + $0xa]]  ;;  %s423_s26 = sld [smem:[#allocation3 + $0xb]] }
  0x1b   :  { %v140_v17 = vld [vmem:[%s139_s20] sm:$0x1]  ;;  %v81_v21 = vadd.f32 %v407_v3, %v78_v11  ;;  %v120_v22 = vmul.f32 5.656854, %v119_v16  ;;  %40 = vst.msk [vmem:[#allocation4] sm:$0x1] %vm39_vm0, %v38_v14 }
  0x1c   :  { %v141_v23 = vmul.f32 5.656854, %v140_v17  ;;  %v161_v24 = vld [vmem:[%s160_s11] sm:$0x1]  ;;  %v102_v26 = vadd.f32 %v409_v4, %v99_v15  ;;  %61 = vst.msk [vmem:[#allocation4 + $0x1] sm:$0x1] %vm39_vm0, %v60_v20 }
  0x1d   :  { %v162_v27 = vmul.f32 5.656854, %v161_v24  ;;  %v182_v28 = vld [vmem:[%s181_s16] sm:$0x1]  ;;  %82 = vst.msk [vmem:[#allocation4 + $0x2] sm:$0x1] %vm39_vm0, %v81_v21  ;;  %v123_v30 = vadd.f32 %v411_v8, %v120_v22 }
  0x1e   :  { %v203_v29 = vld [vmem:[%s202_s18] sm:$0x1]  ;;  %v144_v31 = vadd.f32 %v413_v9, %v141_v23  ;;  %v183_v32 = vmul.f32 5.656854, %v182_v28  ;;  %103 = vst.msk [vmem:[#allocation4 + $0x3] sm:$0x1] %vm39_vm0, %v102_v26 }
  0x1f   :  { %v204_v33 = vmul.f32 5.656854, %v203_v29  ;;  %v224_v34 = vld [vmem:[%s223_s28] sm:$0x1]  ;;  %v165_v35 = vadd.f32 %v415_v13, %v162_v27  ;;  %124 = vst.msk [vmem:[#allocation4 + $0x4] sm:$0x1] %vm39_vm0, %v123_v30 }
  0x20   :  { %v225_v36 = vmul.f32 5.656854, %v224_v34  ;;  %145 = vst.msk [vmem:[#allocation4 + $0x5] sm:$0x1] %vm39_vm0, %v144_v31  ;;  %v186_v37 = vadd.f32 %v417_v18, %v183_v32  ;;  %s425_s5 = sld [smem:[#allocation3 + $0xc]]  ;;  %s427_s29 = sld [smem:[#allocation3 + $0xd]] }
  0x21   :  { %v207_v38 = vadd.f32 %v206_v19, %v204_v33  ;;  %166 = vst.msk [vmem:[#allocation4 + $0x6] sm:$0x1] %vm39_vm0, %v165_v35  ;;  %s429_s30 = sld [smem:[#allocation3 + $0xe]] }
  0x22   :  { %v228_v39 = vadd.f32 %v420_v25, %v225_v36  ;;  %187 = vst.msk [vmem:[#allocation4 + $0x7] sm:$0x1] %vm39_vm0, %v186_v37 }
  0x23   :  { %208 = vst.msk [vmem:[#allocation4 + $0x8] sm:$0x1] %vm39_vm0, %v207_v38 }
  0x24   :  { %14 = vsyncpa [#allocation5], 0  ;;  %229 = vst.msk [vmem:[#allocation4 + $0x9] sm:$0x1] %vm39_vm0, %v228_v39  ;;  %s476_s6 = smov [#allocation4]   ;;  %s244_s9 = scalar_lea.vmem %s651_s1, %s421_s25 }
  0x25   :  { %s592_s20 = sshll.u32 %s476_s6, 4  ;;  %v422_v40 = vld [vmem:[%s652_s2 + $0x2] sm:$0x1]  ;;  %s265_s21 = scalar_lea.vmem %s651_s1, %s423_s26  ;;  %v424_v41 = vld [vmem:[%s652_s2 + $0x3] sm:$0x1]  ;;  %s362_s20 = int_to_ptr.vmem [resolvable:$true] %s592_s20 }
  0x26   :  { %v426_v42 = vld [vmem:[%s652_s2 + $0x4] sm:$0x1]  ;;  %v245_v43 = vld [vmem:[%s244_s9] sm:$0x1]  ;;  %s286_s18 = scalar_lea.vmem %s651_s1, %s425_s5  ;;  %s307_s19 = scalar_lea.vmem %s651_s1, %s427_s29  ;;  %v428_v45 = vld [vmem:[%s652_s2 + $0x5] sm:$0x1] }
  0x27   :  { %v266_v44 = vld [vmem:[%s265_s21] sm:$0x1]  ;;  %v430_v46 = vld [vmem:[%s652_s2 + $0x6] sm:$0x1]  ;;  %v246_v47 = vmul.f32 5.656854, %v245_v43  ;;  %s328_s8 = scalar_lea.vmem %s651_s1, %s429_s30  ;;  %s349_s11 = scalar_lea.vmem %s651_s1, %s589_s4 }
  0x28   :  { %v267_v48 = vmul.f32 5.656854, %v266_v44  ;;  %v287_v49 = vld [vmem:[%s286_s18] sm:$0x1]  ;;  %v432_v50 = vld [vmem:[%s652_s2 + $0x7] sm:$0x1]  ;;  %p454_p6 = scmp.lt.s32.totalorder %s362_s20, %s362_s20 }
  0x29   :  { %v288_v51 = vmul.f32 5.656854, %v287_v49  ;;  %v308_v52 = vld [vmem:[%s307_s19] sm:$0x1]  ;;  %v249_v54 = vadd.f32 %v422_v40, %v246_v47  ;;  %s449_s1 = scalar_lea.vmem %s362_s20, 256 }
  0x2a   :  { %v329_v53 = vld [vmem:[%s328_s8] sm:$0x1]  ;;  %v270_v55 = vadd.f32 %v424_v41, %v267_v48  ;;  %v309_v56 = vmul.f32 5.656854, %v308_v52  ;;  %p450_p5 = scmp.ne.s32.totalorder %s362_s20, %s449_s1  ;;  %p455_p7 = scmp.lt.s32.totalorder %s449_s1, %s449_s1 }
  0x2b   :  { %v330_v57 = vmul.f32 5.656854, %v329_v53  ;;  %v350_v58 = vld [vmem:[%s349_s11] sm:$0x1]  ;;  %v291_v59 = vadd.f32 %v426_v42, %v288_v51  ;;  %250 = vst.msk [vmem:[#allocation4 + $0xa] sm:$0x1] %vm39_vm0, %v249_v54 }
  0x2c   :  { %v351_v60 = vmul.f32 5.656854, %v350_v58  ;;  %271 = vst.msk [vmem:[#allocation4 + $0xb] sm:$0x1] %vm39_vm0, %v270_v55  ;;  %v312_v61 = vadd.f32 %v428_v45, %v309_v56  ;;  %p456_p8 = por %p455_p7, %p454_p6 }
  0x2d   :  { %v333_v62 = vadd.f32 %v430_v46, %v330_v57  ;;  %292 = vst.msk [vmem:[#allocation4 + $0xc] sm:$0x1] %vm39_vm0, %v291_v59 }
  0x2e   :  { %v354_v63 = vadd.f32 %v432_v50, %v351_v60  ;;  %313 = vst.msk [vmem:[#allocation4 + $0xd] sm:$0x1] %vm39_vm0, %v312_v61  ;;  %p457_p9 = pnand %p456_p8, %p450_p5 }
  0x2f   :  { %334 = vst.msk [vmem:[#allocation4 + $0xe] sm:$0x1] %vm39_vm0, %v333_v62 }
  0x30   :  { %355 = vst.msk [vmem:[#allocation4 + $0xf] sm:$0x1] %vm39_vm0, %v354_v63 }
  0x31   :  { %460 = shalt.err (!%p457_p9)
}
  0x32   :  { %s461_s4 = scalar_lea.hbm %s653_s3, 256 }
  0x33   :  { %p462_p10 = scmp.ne.s32.totalorder %s653_s3, %s461_s4  ;;  %p465_p11 = scmp.lt.u32.totalorder %s461_s4, %s653_s3 }
  0x35   :  { %p467_p12 = pnand %p465_p11, %p462_p10 }
  0x37   :  { %470 = shalt.err (!%p467_p12)
}
  0x38   :  { %s477_s0 = smov 128   ;;  %s478_s15 = smov 8  }
  0x39   :  { %367 = dma.vmem_to_hbm [thread:$0]  %s362_s20, 256, %s653_s3, [#allocation5], %s477_s0, %s477_s0, %s478_s15  }
  0x3a   :  { %473 = dma.done.wait [#allocation5], 256  }
  0x3b   :  { %474 = vsyncadd [#allocation5], 4294967040 }
  0x3c   :  { %371 = vsyncpa [#allocation5], 1 }

</bundles_post_ra>
